<compile_context>
chip_gen: v6e
topology: v6e:2x2x1
jax: 0.10.0
libtpu: 0.0.40
codegen_flags: <defaults>
</compile_context>

<pallas_src>
import jax
import jax.numpy as jnp
from jax import lax
from jax.experimental import pallas as pl
from jax.experimental.pallas import tpu as pltpu


_LANE = 128
_VMEM_TILE_BUDGET = 24 * 1024 * 1024   # budget for double-buffered x/out tiles
_VMEM_LIMIT_BYTES = 48 * 1024 * 1024   # > v5e's 16 MiB default scoped limit, < v7x's 64 MiB physical


def _round_up(x, m):
    return ((x + m - 1) // m) * m


def actor_kernel(x_ref, w1_ref, w2_ref, wh_ref, b_ref, out_ref):
    """One batch tile of the Actor MLP, computed with batch on the lane axis."""
    h1_dim = w1_ref.shape[0]
    h2_dim = w2_ref.shape[0]
    two_out = wh_ref.shape[0]

    x = x_ref[...]                                        # (tb, in_dim) bf16, batch-major

    # layer1 (orientation flip folded into the dot):
    #   h1t[o, b] = sum_k w1[o, k] * x[b, k]   -> (64, tb), f32 MXU accumulation
    h1t = lax.dot_general(w1_ref[...], x, (((1,), (1,)), ((), ())),
                          preferred_element_type=jnp.float32)
    h1t = jnp.maximum(h1t + b_ref[0:h1_dim, :], 0.0).astype(jnp.bfloat16)

    # layer2: (32, 64) @ (64, tb) -> (32, tb)
    h2t = jnp.dot(w2_ref[...], h1t, preferred_element_type=jnp.float32)
    h2t = jnp.maximum(h2t + b_ref[h1_dim:h1_dim + h2_dim, :], 0.0).astype(jnp.bfloat16)

    # fused heads: (2*out, 32) @ (32, tb) -> (2*out, tb); rows [0:out)=mu, [out:2*out)=sigma
    out = jnp.dot(wh_ref[...], h2t, preferred_element_type=jnp.float32)
    out = out + b_ref[h1_dim + h2_dim:h1_dim + h2_dim + two_out, :]
    out_ref[...] = out.astype(out_ref.dtype)              # dense 128-lane stores


def _choose_batch_tile(B, two_out, batch_tile):
    A = _LANE                                  # out tile is (2*out, tb): tb lives on lanes
    b_pad_min = _round_up(B, A)
    tb = max(A, (min(batch_tile, b_pad_min) // A) * A)
    # Prefer >= 2 batch tiles when the batch allows it, so the "parallel" axis can
    # shard across v7x's two TensorCores and the pipeline has some depth.
    if b_pad_min >= 2 * A and _round_up(B, tb) // tb < 2:
        tb = max(A, ((b_pad_min // 2) // A) * A)
    # VMEM accounting: double-buffered x tile (bf16, lanes padded 16->128) + out tile (f32).
    bytes_per_row = 2 * (_LANE * 2) + 2 * (two_out * 4)
    max_tb = max(A, (_VMEM_TILE_BUDGET // bytes_per_row // A) * A)
    return min(tb, max_tb)


def actor_forward(x, params, *, batch_tile=8192):
    """x: (B, input_dim).  Returns (mu, sigma), each (B, output_dim) float32.

    For peak throughput pass x already as bfloat16 (avoids one cast pass over HBM)
    and use a batch that is a multiple of the chosen tile (avoids the pad copy)."""
    B, in_dim = x.shape
    w1, w2, wh, b_fused = params["w1"], params["w2"], params["wh"], params["b_fused"]
    h1_dim, h2_dim, two_out = w1.shape[0], w2.shape[0], wh.shape[0]
    out_dim = two_out // 2

    tb = _choose_batch_tile(B, two_out, batch_tile)
    b_pad = _round_up(B, tb)
    grid = (b_pad // tb,)

    if x.dtype != jnp.bfloat16:
        x = x.astype(jnp.bfloat16)
    if b_pad != B:
        x = jnp.pad(x, ((0, b_pad - B), (0, 0)))   # zero rows; sliced off below

    const = lambda i: (0, 0)
    fused_t = pl.pallas_call(
        actor_kernel,
        out_shape=jax.ShapeDtypeStruct((two_out, b_pad), jnp.float32),
        grid_spec=pltpu.PrefetchScalarGridSpec(
            num_scalar_prefetch=0,
            grid=grid,
            in_specs=[
                pl.BlockSpec((tb, in_dim), lambda i: (i, 0)),   # x: batch tiles, natural layout
                pl.BlockSpec((h1_dim, in_dim), const),          # w1 (torch (out,in)), bf16, resident
                pl.BlockSpec((h2_dim, h1_dim), const),          # w2
                pl.BlockSpec((two_out, h2_dim), const),         # fused [mu; sigma] head
                pl.BlockSpec(tuple(b_fused.shape), const),      # fused biases, f32
            ],
            out_specs=pl.BlockSpec((two_out, tb), lambda i: (0, i)),
        ),
        compiler_params=pltpu.CompilerParams(
            dimension_semantics=("parallel",),
            vmem_limit_bytes=_VMEM_LIMIT_BYTES,
        ),
    )(x, w1, w2, wh, b_fused)

    out_t = fused_t[:, :B]                 # (2*out, B) lane-dense kernel output
    mu = out_t[:out_dim, :].T              # tiny wrapper-side transposes back to (B, out)
    sigma = out_t[out_dim:, :].T
    return mu, sigma


def init_params(key, input_dim, output_dim, h1_dim=64, h2_dim=32):
    """torch.nn.Linear default init U(-1/sqrt(fan_in), 1/sqrt(fan_in)), weights kept in
    torch (out_features, in_features) layout, stored bf16; biases fused, stored f32."""
    def linear(k, fan_in, fan_out):
        kw, kb = jax.random.split(k)
        bound = 1.0 / (fan_in ** 0.5)
        w = jax.random.uniform(kw, (fan_out, fan_in), jnp.float32, -bound, bound)
        b = jax.random.uniform(kb, (fan_out,), jnp.float32, -bound, bound)
        return w, b

    k1, k2, k3, k4 = jax.random.split(key, 4)
    w1, b1 = linear(k1, input_dim, h1_dim)
    w2, b2 = linear(k2, h1_dim, h2_dim)
    wmu, bmu = linear(k3, h2_dim, output_dim)
    wsg, bsg = linear(k4, h2_dim, output_dim)
    wh = jnp.concatenate([wmu, wsg], axis=0)          # (2*out, 32): rows 0:out -> mu, out:2*out -> sigma
    bh = jnp.concatenate([bmu, bsg], axis=0)
    b_fused = jnp.concatenate([b1, b2, bh], axis=0).reshape(-1, 1).astype(jnp.float32)
    return dict(
        w1=w1.astype(jnp.bfloat16),
        w2=w2.astype(jnp.bfloat16),
        wh=wh.astype(jnp.bfloat16),
        b_fused=b_fused,
    )


def actor_forward_ref(x, params):
    """Pure-JAX reference mirroring the kernel's dtype strategy (bf16 operands, f32 accum)."""
    xb = x.astype(jnp.bfloat16)
    w1, w2, wh = params["w1"], params["w2"], params["wh"]
    b = params["b_fused"][:, 0]
    h1_dim, h2_dim, two_out = w1.shape[0], w2.shape[0], wh.shape[0]
    b1, b2, bh = b[:h1_dim], b[h1_dim:h1_dim + h2_dim], b[h1_dim + h2_dim:h1_dim + h2_dim + two_out]
    h1 = jnp.maximum(jnp.dot(xb, w1.T, preferred_element_type=jnp.float32) + b1, 0.0).astype(jnp.bfloat16)
    h2 = jnp.maximum(jnp.dot(h1, w2.T, preferred_element_type=jnp.float32) + b2, 0.0).astype(jnp.bfloat16)
    out = jnp.dot(h2, wh.T, preferred_element_type=jnp.float32) + bh
    out_dim = two_out // 2
    return out[:, :out_dim], out[:, out_dim:]


if __name__ == "__main__":
    key = jax.random.PRNGKey(0)
    k_x, k_x2, k_p = jax.random.split(key, 3)

    batch = 8
    input_dim = 16     # input_shape[0]
    output_dim = 4     # output_shape

    params = init_params(k_p, input_dim, output_dim)

    # Small batch (single tile, padded 8 -> 128 rows internally).
    x = jax.random.normal(k_x, (batch, input_dim), jnp.float32)
    mu, sigma = actor_forward(x, params)
    jax.block_until_ready((mu, sigma))
    mu_ref, sigma_ref = actor_forward_ref(x, params)
    assert mu.shape == (batch, output_dim) and sigma.shape == (batch, output_dim)
    assert jnp.allclose(mu, mu_ref, atol=1e-2, rtol=1e-2)
    assert jnp.allclose(sigma, sigma_ref, atol=1e-2, rtol=1e-2)

    # Awkward, larger batch: exercises the multi-tile "parallel" grid and the
    # pad-and-slice fallback (no rows dropped).
    batch2 = 1000
    x2 = jax.random.normal(k_x2, (batch2, input_dim), jnp.float32)
    mu2, sigma2 = actor_forward(x2, params)
    jax.block_until_ready((mu2, sigma2))
    mu2_ref, sigma2_ref = actor_forward_ref(x2, params)
    assert mu2.shape == (batch2, output_dim) and sigma2.shape == (batch2, output_dim)
    assert jnp.allclose(mu2, mu2_ref, atol=1e-2, rtol=1e-2)
    assert jnp.allclose(sigma2, sigma2_ref, atol=1e-2, rtol=1e-2)

    print("KERNEL_OK")
</pallas_src>

<mosaic_0001>
module attributes {stable_mosaic.version = 11 : i64} {
  func.func @actor_kernel(%arg0: i32, %arg1: memref<128x16xbf16, #tpu.memory_space<vmem>>, %arg2: memref<64x16xbf16, #tpu.memory_space<vmem>>, %arg3: memref<32x64xbf16, #tpu.memory_space<vmem>>, %arg4: memref<8x32xbf16, #tpu.memory_space<vmem>>, %arg5: memref<104x1xf32, #tpu.memory_space<vmem>>, %arg6: memref<8x128xf32, #tpu.memory_space<vmem>>) attributes {dimension_semantics = [#tpu.dimension_semantics<parallel>], iteration_bounds = array<i64: 1>, scalar_prefetch = 0 : i64, scratch_operands = 0 : i64, tpu.core_type = #tpu.core_type<tc>, window_params = [{transform_indices = @transform_0, window_bounds = array<i64: 128, 16>}, {pipeline_mode = #tpu.pipeline_mode<synchronous>, transform_indices = @transform_1, window_bounds = array<i64: 64, 16>}, {pipeline_mode = #tpu.pipeline_mode<synchronous>, transform_indices = @transform_2, window_bounds = array<i64: 32, 64>}, {pipeline_mode = #tpu.pipeline_mode<synchronous>, transform_indices = @transform_3, window_bounds = array<i64: 8, 32>}, {pipeline_mode = #tpu.pipeline_mode<synchronous>, transform_indices = @transform_4, window_bounds = array<i64: 104, 1>}, {transform_indices = @transform_5, window_bounds = array<i64: 8, 128>}]} {
    %c0 = arith.constant 0 : index
    %c0_0 = arith.constant 0 : index
    %0 = vector.load %arg1[%c0, %c0_0] : memref<128x16xbf16, #tpu.memory_space<vmem>>, vector<128x16xbf16>
    %c0_1 = arith.constant 0 : index
    %c0_2 = arith.constant 0 : index
    %1 = vector.load %arg2[%c0_1, %c0_2] : memref<64x16xbf16, #tpu.memory_space<vmem>>, vector<64x16xbf16>
    %cst = arith.constant dense<0.000000e+00> : vector<64x128xf32>
    %2 = tpu.matmul %1, %0, %cst {dimension_numbers = #tpu.dot_dimension_numbers<[1], [1], [0], [0], [0, 0, 1, 0], [], []>} : vector<64x16xbf16>, vector<128x16xbf16>, vector<64x128xf32> -> vector<64x128xf32>
    %c0_3 = arith.constant 0 : index
    %c0_4 = arith.constant 0 : index
    %3 = vector.load %arg5[%c0_3, %c0_4] : memref<104x1xf32, #tpu.memory_space<vmem>>, vector<64x1xf32>
    %4 = vector.broadcast %3 : vector<64x1xf32> to vector<64x128xf32>
    %5 = arith.addf %2, %4 : vector<64x128xf32>
    %cst_5 = arith.constant 0.000000e+00 : f32
    %6 = vector.broadcast %cst_5 : f32 to vector<64x128xf32>
    %7 = arith.maximumf %5, %6 : vector<64x128xf32>
    %8 = arith.truncf %7 : vector<64x128xf32> to vector<64x128xbf16>
    %c0_6 = arith.constant 0 : index
    %c0_7 = arith.constant 0 : index
    %9 = vector.load %arg3[%c0_6, %c0_7] : memref<32x64xbf16, #tpu.memory_space<vmem>>, vector<32x64xbf16>
    %cst_8 = arith.constant dense<0.000000e+00> : vector<32x128xf32>
    %10 = tpu.matmul %9, %8, %cst_8 {dimension_numbers = #tpu.dot_dimension_numbers<[1], [0], [0], [1], [0, 0, 1, 1], [], []>} : vector<32x64xbf16>, vector<64x128xbf16>, vector<32x128xf32> -> vector<32x128xf32>
    %c64 = arith.constant 64 : index
    %c0_9 = arith.constant 0 : index
    %11 = vector.load %arg5[%c64, %c0_9] : memref<104x1xf32, #tpu.memory_space<vmem>>, vector<32x1xf32>
    %12 = vector.broadcast %11 : vector<32x1xf32> to vector<32x128xf32>
    %13 = arith.addf %10, %12 : vector<32x128xf32>
    %cst_10 = arith.constant 0.000000e+00 : f32
    %14 = vector.broadcast %cst_10 : f32 to vector<32x128xf32>
    %15 = arith.maximumf %13, %14 : vector<32x128xf32>
    %16 = arith.truncf %15 : vector<32x128xf32> to vector<32x128xbf16>
    %c0_11 = arith.constant 0 : index
    %c0_12 = arith.constant 0 : index
    %17 = vector.load %arg4[%c0_11, %c0_12] : memref<8x32xbf16, #tpu.memory_space<vmem>>, vector<8x32xbf16>
    %cst_13 = arith.constant dense<0.000000e+00> : vector<8x128xf32>
    %18 = tpu.matmul %17, %16, %cst_13 {dimension_numbers = #tpu.dot_dimension_numbers<[1], [0], [0], [1], [0, 0, 1, 1], [], []>} : vector<8x32xbf16>, vector<32x128xbf16>, vector<8x128xf32> -> vector<8x128xf32>
    %c96 = arith.constant 96 : index
    %c0_14 = arith.constant 0 : index
    %19 = vector.load %arg5[%c96, %c0_14] : memref<104x1xf32, #tpu.memory_space<vmem>>, vector<8x1xf32>
    %20 = vector.broadcast %19 : vector<8x1xf32> to vector<8x128xf32>
    %21 = arith.addf %18, %20 : vector<8x128xf32>
    %c0_15 = arith.constant 0 : index
    %c0_16 = arith.constant 0 : index
    %22 = vector.load %arg6[%c0_15, %c0_16] : memref<8x128xf32, #tpu.memory_space<vmem>>, vector<8x128xf32>
    tpu.vector_store %arg6[%c0_15, %c0_16], %21 {strides = array<i32>} : memref<8x128xf32, #tpu.memory_space<vmem>>, vector<8x128xf32>,
    return
  }
  func.func @transform_0(%arg0: i32) -> (i32, i32) {
    %c0_i32 = arith.constant 0 : i32
    %c0_i32_0 = arith.constant 0 : i32
    return %arg0, %c0_i32 : i32, i32
  }
  func.func @transform_1(%arg0: i32) -> (i32, i32) {
    %c0_i32 = arith.constant 0 : i32
    %c0_i32_0 = arith.constant 0 : i32
    %c0_i32_1 = arith.constant 0 : i32
    return %c0_i32, %c0_i32_0 : i32, i32
  }
  func.func @transform_2(%arg0: i32) -> (i32, i32) {
    %c0_i32 = arith.constant 0 : i32
    %c0_i32_0 = arith.constant 0 : i32
    %c0_i32_1 = arith.constant 0 : i32
    return %c0_i32, %c0_i32_0 : i32, i32
  }
  func.func @transform_3(%arg0: i32) -> (i32, i32) {
    %c0_i32 = arith.constant 0 : i32
    %c0_i32_0 = arith.constant 0 : i32
    %c0_i32_1 = arith.constant 0 : i32
    return %c0_i32, %c0_i32_0 : i32, i32
  }
  func.func @transform_4(%arg0: i32) -> (i32, i32) {
    %c0_i32 = arith.constant 0 : i32
    %c0_i32_0 = arith.constant 0 : i32
    %c0_i32_1 = arith.constant 0 : i32
    return %c0_i32, %c0_i32_0 : i32, i32
  }
  func.func @transform_5(%arg0: i32) -> (i32, i32) {
    %c0_i32 = arith.constant 0 : i32
    %c0_i32_0 = arith.constant 0 : i32
    return %c0_i32, %arg0 : i32, i32
  }
}

</mosaic_0001>

<bundles_post_ra>
// kernel: tpu_custom_call.1
= control target key start
LH: loop header
LB: loop body
LE: loop exit
PB: predicated region body
PF: predicated region fallthrough
CT: control target
= control target key end

     0   :  { %vm154_vm0 = vcmask 130048   ;;  %v570_v3 = vmov 0   ;;  %s713_s0 = inlined_call_operand.vmem [shape: bf16[128,16], index: 0, kind: input, shape index: {}]   ;;  %s714_s1 = inlined_call_operand.vmem [shape: bf16[64,16], index: 1, kind: input, shape index: {}]   ;;  %s715_s2 = inlined_call_operand.vmem [shape: bf16[32,64], index: 2, kind: input, shape index: {}]   ;;  %s716_s3 = inlined_call_operand.vmem [shape: bf16[8,32], index: 3, kind: input, shape index: {}]   ;;  %s717_s4 = inlined_call_operand.vmem [shape: f32[104,1], index: 4, kind: input, shape index: {}]   ;;  %s718_s5 = inlined_call_operand.hbm [shape: f32[8,128], index: 5, kind: output, shape index: {}]  }
   0x1   :  { %v534_v0 = vld [vmem:[%s713_s0 + $0x38] sm:$0xff]   ;;  %v535_v1 = vld [vmem:[%s713_s0 + $0x30] sm:$0xff]   ;;  %532 = vset.pattern.permute.xlu0 %v570_v3  ;;  %533 = vset.pattern.permute.xlu1 %v570_v3  ;;  %v536_v4 = vld [vmem:[%s713_s0 + $0x28] sm:$0xff]  }
   0x2   :  { %520 = vmatprep.subr.msk.bf16.mxu0 %vm154_vm0, %v534_v0  ;;  %v189_v2 = vsel %vm154_vm0, %v534_v0, 0  ;;  %v186_v5 = vsel %vm154_vm0, %v535_v1, 0  ;;  %v542_v6 = vld [vmem:[%s714_s1] sm:$0xff]   ;;  %v52_v7 = vld [vmem:[%s717_s4 + $0x30] sm:$0xff]  ;;  %v53_v9 = vld [vmem:[%s717_s4 + $0x38] sm:$0xff]  ;;  %v183_v11 = vsel %vm154_vm0, %v536_v4, 0 }
   0x3   :  { %477 = vmatpush3.bf16.xpose.msra.mxu0 %v189_v2  ;;  %492 = vmatprep.mubr.msk.bf16.mxu0 %vm154_vm0, %v542_v6  ;;  %v50_v8 = vld [vmem:[%s717_s4 + $0x20] sm:$0xff]  ;;  %v51_v10 = vld [vmem:[%s717_s4 + $0x28] sm:$0xff] }
   0x4   :  { %521 = vmatprep.subr.msk.bf16.mxu0 %vm154_vm0, %v535_v1  ;;  %86 = vperm.xlu0 %532, %v52_v7   ;;  %v537_v12 = vld [vmem:[%s713_s0 + $0x20] sm:$0xff]  }
   0x5   :  { %76 = vperm.xlu1 %533, %v50_v8  }
   0x8   :  { %91 = vperm.xlu0 %532, %v53_v9  }
   0x9   :  { %81 = vperm.xlu1 %533, %v51_v10  }
   0xb   :  { %479 = vmatpush3.bf16.xpose.msra.mxu0 %v186_v5 }
   0xc   :  { %522 = vmatprep.subr.msk.bf16.mxu0 %vm154_vm0, %v536_v4 }
   0xd   :  { %10 = vsyncpa [#allocation3], 0  ;;  %v48_v13 = vld [vmem:[%s717_s4 + $0x10] sm:$0xff]  ;;  %v49_v14 = vld [vmem:[%s717_s4 + $0x18] sm:$0xff]  ;;  %v180_v17 = vsel %vm154_vm0, %v537_v12, 0  ;;  %vm306_vm1 = vcmask 523264  }
   0xe   :  { %66 = vperm.xlu0 %532, %v48_v13   ;;  %71 = vperm.xlu1 %533, %v49_v14   ;;  %v46_v15 = vld [vmem:[%s717_s4] sm:$0xff]  ;;  %v47_v16 = vld [vmem:[%s717_s4 + $0x8] sm:$0xff]  ;;  %v538_v18 = vld [vmem:[%s713_s0 + $0x18] sm:$0xff]   ;;  %v571_v8 = vmov 0.0   ;;  %vm572_vm2 = vmmov 0   ;;  %vm375_vm3 = vcmask 261120  }
   0xf   :  { %v274_v19 = vld [vmem:[%s717_s4 + $0x50] sm:$0xff]  ;;  %v275_v20 = vld [vmem:[%s717_s4 + $0x58] sm:$0xff]  ;;  %v272_v21 = vld [vmem:[%s717_s4 + $0x40] sm:$0xff]  ;;  %v177_v23 = vsel %vm154_vm0, %v538_v18, 0  ;;  %s573_s20 = smov [#allocation2]  }
  0x10   :  { %v273_v22 = vld [vmem:[%s717_s4 + $0x48] sm:$0xff]  ;;  %v539_v24 = vld [vmem:[%s713_s0 + $0x10] sm:$0xff]   ;;  %v369_v25 = vld [vmem:[%s717_s4 + $0x60] sm:$0xff]  ;;  %s426_s21 = sshll.u32 %s573_s20, 4  ;;  %s427_s21 = int_to_ptr.vmem [resolvable:$true] %s426_s21 }
  0x11   :  { %v174_v26 = vsel %vm154_vm0, %v539_v24, 0  ;;  %v540_v27 = vld [vmem:[%s713_s0 + $0x8] sm:$0xff]   ;;  %v541_v29 = vld [vmem:[%s713_s0] sm:$0xff]   ;;  %v544_v32 = vld [vmem:[%s714_s1 + $0x10] sm:$0xff]   ;;  %s548_s22 = scalar_lea.vmem %s427_s21, 128  ;;  %p553_p1 = scmp.lt.s32.totalorder %s427_s21, %s427_s21 }
  0x12   :  { %56 = vperm.xlu0 %532, %v46_v15   ;;  %61 = vperm.xlu1 %533, %v47_v16   ;;  %v171_v28 = vsel %vm154_vm0, %v540_v27, 0  ;;  %v168_v30 = vsel %vm154_vm0, %v541_v29, 0  ;;  %v543_v31 = vld [vmem:[%s714_s1 + $0x8] sm:$0xff]   ;;  %v545_v33 = vld [vmem:[%s714_s1 + $0x18] sm:$0xff]   ;;  %v546_v34 = vld [vmem:[%s715_s2] sm:$0xff]   ;;  %p549_p0 = scmp.ne.s32.totalorder %s427_s21, %s548_s22  ;;  %p554_p2 = scmp.lt.s32.totalorder %s548_s22, %s548_s22 }
  0x13   :  { %481 = vmatpush3.bf16.xpose.msra.mxu0 %v183_v11  ;;  %508 = vmatprep.mubr.msk.bf16.mxu1 %vm306_vm1, %v546_v34  ;;  %v547_v7 = vld [vmem:[%s715_s2 + $0x8] sm:$0xff]  }
  0x14   :  { %523 = vmatprep.subr.msk.bf16.mxu0 %vm154_vm0, %v537_v12  ;;  %p555_p3 = por %p554_p2, %p553_p1 }
  0x16   :  { %288 = vperm.xlu0 %532, %v274_v19   ;;  %293 = vperm.xlu1 %533, %v275_v20   ;;  %p556_p4 = pnand %p555_p3, %p549_p0 }
  0x1a   :  { %278 = vperm.xlu0 %532, %v272_v21   ;;  %283 = vperm.xlu1 %533, %v273_v22  }
  0x1b   :  { %483 = vmatpush3.bf16.xpose.msra.mxu0 %v180_v17 }
  0x1c   :  { %524 = vmatprep.subr.msk.bf16.mxu0 %vm154_vm0, %v538_v18 }
  0x1e   :  { %372 = vperm.xlu0 %532, %v369_v25  }
  0x23   :  { %485 = vmatpush3.bf16.xpose.msra.mxu0 %v177_v23 }
  0x24   :  { %525 = vmatprep.subr.msk.bf16.mxu0 %vm154_vm0, %v539_v24 }
  0x2b   :  { %487 = vmatpush3.bf16.xpose.msra.mxu0 %v174_v26 }
  0x2c   :  { %526 = vmatprep.subr.msk.bf16.mxu0 %vm154_vm0, %v540_v27  ;;  %v368_v27 = vld [vmem:[%s716_s3] sm:$0xf] }
  0x33   :  { %489 = vmatpush3.bf16.xpose.msra.mxu0 %v171_v28 }
  0x34   :  { %527 = vmatprep.subr.msk.bf16.mxu0 %vm154_vm0, %v541_v29 }
  0x3b   :  { %491 = vmatpush3.bf16.xpose.msra.mxu0 %v168_v30 }
  0x42   :  { %493 = vmatmul.mubr.msk.bf16.vlgmr.msra.gmra.mxu0 %vm154_vm0, %v543_v31 }
  0x43   :  { %496 = vmatprep.mubr.msk.bf16.mxu0 %vm154_vm0, %v544_v32 }
  0x4a   :  { %497 = vmatmul.mubr.msk.bf16.gmra.mxu0 %vm154_vm0, %v545_v33 }
  0x7f   :  { %v87_v37 = vpop.permute.xlu0 %86 }
  0x80   :  { %v77_v35 = vpop.permute.xlu1 %76 }
  0x83   :  { %v92_v42 = vpop.permute.xlu0 %91 }
  0x84   :  { %v82_v40 = vpop.permute.xlu1 %81 }
  0x89   :  { %v72_v46 = vpop.permute.xlu1 %71  ;;  %v67_v50 = vpop.permute.xlu0 %66 }
  0x8d   :  { %v62_v60 = vpop.permute.xlu1 %61  ;;  %v57_v0 = vpop.permute.xlu0 %56 }
  0x91   :  { %v289_v9 = vpop.permute.xlu0 %288  ;;  %v294_v10 = vpop.permute.xlu1 %293 }
  0x95   :  { %v279_v15 = vpop.permute.xlu0 %278  ;;  %v284_v17 = vpop.permute.xlu1 %283 }
  0x99   :  { %v373_v28 = vpop.permute.xlu0 %372 }
 0x102   :  { %v494_v36 = vpop.f32.mrf.mxu0 }
 0x103   :  { %v234_v56 = vadd.f32 %v494_v36, %v67_v50 }
 0x104   :  { %v225_v38 = vpop.f32.mrf.mxu0 }
 0x105   :  { %v258_v1 = vmax.f32 %v234_v56, 0.0  ;;  %v226_v2 = vadd.f32 %v225_v38, %v57_v0 }
 0x106   :  { %v495_v39 = vpop.f32.mrf.mxu0 }
 0x107   :  { %v237_v52 = vadd.f32 %v495_v39, %v72_v46  ;;  %v256_v5 = vmax.f32 %v226_v2, 0.0 }
 0x108   :  { %v228_v41 = vpop.f32.mrf.mxu0 }
 0x109   :  { %v259_v61 = vmax.f32 %v237_v52, 0.0  ;;  %v229_v62 = vadd.f32 %v228_v41, %v62_v60 }
 0x10a   :  { %v498_v43 = vpop.f32.mrf.mxu0 }
 0x10b   :  { %v250_v45 = vadd.f32 %v498_v43, %v87_v37  ;;  %v265_v3 = vpack.c.bf16 %v259_v61, %v258_v1  ;;  %v257_v4 = vmax.f32 %v229_v62, 0.0 }
 0x10c   :  { %v241_v44 = vpop.f32.mrf.mxu0 }
 0x10d   :  { %v242_v48 = vadd.f32 %v241_v44, %v77_v35  ;;  %v262_v53 = vmax.f32 %v250_v45, 0.0  ;;  %v264_v6 = vpack.c.bf16 %v257_v4, %v256_v5 }
 0x10e   :  { %v499_v47 = vpop.f32.mrf.mxu0 }
 0x10f   :  { %v253_v49 = vadd.f32 %v499_v47, %v92_v42  ;;  %v260_v57 = vmax.f32 %v242_v48, 0.0 }
 0x110   :  { %v244_v51 = vpop.f32.mrf.mxu0 }
 0x111   :  { %v263_v54 = vmax.f32 %v253_v49, 0.0  ;;  %v245_v55 = vadd.f32 %v244_v51, %v82_v40 }
 0x113   :  { %v261_v58 = vmax.f32 %v245_v55, 0.0  ;;  %v267_v59 = vpack.c.bf16 %v263_v54, %v262_v53 }
 0x115   :  { %v266_v63 = vpack.c.bf16 %v261_v58, %v260_v57  ;;  %500 = vmatprep.subr.bf16.mxu1 %v267_v59 }
 0x116   :  { %501 = vmatpush3.bf16.msra.mxu1 %v267_v59 }
 0x117   :  { %502 = vmatprep.subr.bf16.mxu1 %v266_v63 }
 0x11a   :  { %503 = vmatpush3.bf16.msra.mxu1 %v266_v63 }
 0x11b   :  { %504 = vmatprep.subr.bf16.mxu1 %v265_v3 }
 0x11e   :  { %505 = vmatpush3.bf16.msra.mxu1 %v265_v3 }
 0x11f   :  { %506 = vmatprep.subr.bf16.mxu1 %v264_v6 }
 0x122   :  { %507 = vmatpush3.bf16.msra.mxu1 %v264_v6 }
 0x123   :  { %512 = vmatprep.subr.bf16.mxu1 %v571_v8 }
 0x125   :  { %509 = vmatmul.mubr.msk.bf16.vlgmr.msra.gmra.mxu1 %vm306_vm1, %v547_v7 }
 0x126   :  { %516 = vmatprep.mubr.msk.bf16.mxu1 %vm572_vm2, %v571_v8 }
 0x1e5   :  { %v510_v11 = vpop.f32.mrf.mxu1 }
 0x1e6   :  { %v356_v13 = vadd.f32 %v510_v11, %v289_v9 }
 0x1e7   :  { %v347_v12 = vpop.f32.mrf.mxu1 }
 0x1e8   :  { %v364_v19 = vmax.f32 %v356_v13, 0.0  ;;  %v348_v20 = vadd.f32 %v347_v12, %v279_v15 }
 0x1e9   :  { %v511_v14 = vpop.f32.mrf.mxu1 }
 0x1ea   :  { %v359_v16 = vadd.f32 %v511_v14, %v294_v10  ;;  %v362_v25 = vmax.f32 %v348_v20, 0.0 }
 0x1eb   :  { %v350_v18 = vpop.f32.mrf.mxu1 }
 0x1ec   :  { %v365_v21 = vmax.f32 %v359_v16, 0.0  ;;  %v351_v22 = vadd.f32 %v350_v18, %v284_v17 }
 0x1ee   :  { %v367_v23 = vpack.c.bf16 %v365_v21, %v364_v19  ;;  %v363_v24 = vmax.f32 %v351_v22, 0.0 }
 0x1f0   :  { %513 = vmatpush3.bf16.msra.mxu1 %v367_v23  ;;  %v366_v26 = vpack.c.bf16 %v363_v24, %v362_v25 }
 0x1f1   :  { %514 = vmatprep.subr.bf16.mxu1 %v571_v8 }
 0x1f4   :  { %515 = vmatpush3.bf16.msra.mxu1 %v366_v26 }
 0x1f7   :  { %517 = vmatmul.mubr.msk.bf16.vlgmr.msra.gmra.mxu1 %vm375_vm3, %v368_v27 }
 0x2b7   :  { %v413_v29 = vpop.f32.mrf.mxu1 }
 0x2b8   :  { %v414_v30 = vadd.f32 %v413_v29, %v373_v28 }
 0x2b9   :  { %v518_v31 = vpop.f32.mrf.mxu1 }
 0x2ba   :  { %419 = vst [vmem:[#allocation2] sm:$0xff] %v414_v30 }
 0x2bb   :  { %v416_v32 = vpop.f32.mrf.mxu1 }
 0x2bc   :  { %559 = shalt.err (!%p556_p4)
}
 0x2bd   :  { %429 = dma.vmem_to_hbm [thread:$0]  %s427_s21, 128, %s718_s5, [#allocation3]   ;;  %v519_v33 = vpop.f32.mrf.mxu1 }
 0x2be   :  { %568 = dma.done.wait [#allocation3], 128  }
 0x2bf   :  { %569 = vsyncadd [#allocation3], 4294967168 }
 0x2c0   :  { %433 = vsyncpa [#allocation3], 1 }

</bundles_post_ra>
